<compile_context>
chip_gen: v7x
topology: tpu7x:2x2x1
jax: 0.10.0
libtpu: 0.0.40
codegen_flags: <defaults>
</compile_context>

<pallas_src>
import math

import jax
import jax.numpy as jnp
from jax.experimental import pallas as pl
from jax.experimental.pallas import tpu as pltpu


def _round_up(x: int, m: int) -> int:
    return (x + m - 1) // m * m


def _spread_embedding_kernel(tok_ref, table_ref, out_ref):
    # tok_ref:   [TR, P]        int32  -- P tokens packed per output row
    # table_ref: [P*Vp, P*E]    table dtype, block-diagonal: row p*Vp + v carries
    #                           table[v] in lanes [p*E, (p+1)*E), zeros elsewhere
    # out_ref:   [TR, P*E]      table dtype; P*E is a multiple of 128 when E | 128,
    #                           so stores are unmasked lane-dense vst
    tr = out_ref.shape[0]
    k = table_ref.shape[0]          # P * Vp
    p = tok_ref.shape[1]            # packing factor
    v_pad = k // p

    col = jax.lax.broadcasted_iota(jnp.int32, (tr, k), 1)
    # One-hot over the block-diagonal K axis: column p*Vp + tok[r, p] is hot.
    hit = col == tok_ref[:, 0:1]
    for pi in range(1, p):
        hit = hit | (col == (tok_ref[:, pi:pi + 1] + pi * v_pad))
    onehot = hit.astype(table_ref.dtype)

    # Gather via MXU matmul (f32 accumulate, emit in the table's dtype).
    out_ref[...] = jnp.dot(
        onehot, table_ref[...], preferred_element_type=jnp.float32
    ).astype(out_ref.dtype)


def prepare_spread_embedding_table(table: jax.Array) -> dict:
    """One-time (module init) prep: pick packing factor P and build the
    block-diagonal, vocab-padded table in the table's own dtype."""
    vocab, emb = table.shape
    if emb < 128 and 128 % emb == 0:
        pack = 128 // emb           # P tokens per 128-lane output row
    else:
        pack = 1                    # emb already lane-dense (>=128) or non-divisor
    # Pad vocab so the total K dim (pack * v_pad) is a multiple of 128 (full MXU tiles).
    v_pad = _round_up(vocab, max(8, 128 // pack))
    bd = jnp.zeros((pack * v_pad, pack * emb), dtype=table.dtype)
    for p in range(pack):
        bd = bd.at[p * v_pad:p * v_pad + vocab, p * emb:(p + 1) * emb].set(table)
    return {"table": bd, "pack": pack, "vocab": vocab, "emb": emb}


def action_tokenized_spread_embedding(tokens: jax.Array, prepared: dict,
                                      *, tokens_per_tile: int = 2048) -> jax.Array:
    """tokens: int array of arbitrary leading shape -> embeddings of shape (*tokens.shape, emb)."""
    table_bd = prepared["table"]
    pack = prepared["pack"]
    emb = prepared["emb"]
    k, pe = table_bd.shape

    lead = tokens.shape
    n = math.prod(lead) if lead else 1
    rows = -(-n // pack)                               # ceil(n / P)

    # Row tile: multiple of 8 (sublane), ~tokens_per_tile tokens per grid step.
    rows_tile = min(max(8, _round_up(tokens_per_tile // pack, 8)),
                    _round_up(rows, 8))
    # Ensure the "parallel" grid has >= 2 steps when possible (v7x has 2 TensorCores).
    if _round_up(rows, rows_tile) == rows_tile and rows_tile > 8:
        rows_tile = _round_up(rows_tile // 2, 8)
    rows_pad = _round_up(rows, rows_tile)
    grid = rows_pad // rows_tile

    # Token prep: flat, int32, pad only if needed, pack P per row.
    flat = tokens.reshape(-1)
    if flat.dtype != jnp.int32:
        flat = flat.astype(jnp.int32)
    if rows_pad * pack != n:
        flat = jnp.pad(flat, (0, rows_pad * pack - n))
    tok2d = flat.reshape(rows_pad, pack)

    out = pl.pallas_call(
        _spread_embedding_kernel,
        out_shape=jax.ShapeDtypeStruct((rows_pad, pe), table_bd.dtype),
        grid_spec=pl.GridSpec(
            grid=(grid,),
            in_specs=[
                pl.BlockSpec((rows_tile, pack), lambda i: (i, 0)),   # packed token tile
                pl.BlockSpec((k, pe), lambda i: (0, 0)),             # resident table
            ],
            out_specs=pl.BlockSpec((rows_tile, pe), lambda i: (i, 0)),
        ),
        compiler_params=pltpu.CompilerParams(
            dimension_semantics=("parallel",),   # independent row tiles -> megacore
        ),
    )(tok2d, table_bd)

    # Contiguous reshape [rows_pad, P*E] -> [rows_pad*P, E]; slice only if padded.
    out = out.reshape(rows_pad * pack, emb)
    if rows_pad * pack != n:
        out = out[:n]
    return out.reshape(*lead, emb)


if __name__ == "__main__":
    # Module hyperparameters (small, consistent with __init__ signature)
    action_dim = 4
    embedding_dim = 32
    token_size = 32          # vocab size of nn.Embedding(token_size, embedding_dim)

    bs, seq_len = 2, 8

    key = jax.random.PRNGKey(0)
    k_tab, k_tok = jax.random.split(key)

    # Deterministic parameter init (nn.Embedding default ~ N(0,1))
    emb_table = jax.random.normal(k_tab, (token_size, embedding_dim), dtype=jnp.float32)

    # Integer action tokens: [bs, seq_len, action_dim]
    x = jax.random.randint(k_tok, (bs, seq_len, action_dim), 0, token_size, dtype=jnp.int32)

    # One-time table prep (module init), then the forward pass.
    prepared = prepare_spread_embedding_table(emb_table)
    y = action_tokenized_spread_embedding(x, prepared)
    jax.block_until_ready(y)

    # Correctness check vs plain-JAX reference (table[x])
    y_ref = emb_table[x]
    assert y.shape == (bs, seq_len, action_dim, embedding_dim), y.shape
    assert y.dtype == emb_table.dtype, y.dtype
    assert jnp.allclose(y, y_ref, atol=1e-6), "mismatch vs reference embedding lookup"

    print("KERNEL_OK")
</pallas_src>

<mosaic_0001>
module attributes {stable_mosaic.version = 11 : i64} {
  func.func @_spread_embedding_kernel(%arg0: i32, %arg1: memref<8x4xi32, #tpu.memory_space<vmem>>, %arg2: memref<128x128xf32, #tpu.memory_space<vmem>>, %arg3: memref<8x128xf32, #tpu.memory_space<vmem>>) attributes {dimension_semantics = [#tpu.dimension_semantics<parallel>], iteration_bounds = array<i64: 2>, scalar_prefetch = 0 : i64, scratch_operands = 0 : i64, tpu.core_type = #tpu.core_type<tc>, window_params = [{transform_indices = @transform_0, window_bounds = array<i64: 8, 4>}, {pipeline_mode = #tpu.pipeline_mode<synchronous>, transform_indices = @transform_1, window_bounds = array<i64: 128, 128>}, {transform_indices = @transform_2, window_bounds = array<i64: 8, 128>}]} {
    %0 = tpu.iota {dimensions = array<i32: 1>} : vector<8x128xi32>
    %c0 = arith.constant 0 : index
    %c0_0 = arith.constant 0 : index
    %1 = vector.load %arg1[%c0, %c0_0] : memref<8x4xi32, #tpu.memory_space<vmem>>, vector<8x1xi32>
    %2 = vector.broadcast %1 : vector<8x1xi32> to vector<8x128xi32>
    %3 = arith.cmpi eq, %0, %2 : vector<8x128xi32>
    %c0_1 = arith.constant 0 : index
    %c1 = arith.constant 1 : index
    %4 = vector.load %arg1[%c0_1, %c1] : memref<8x4xi32, #tpu.memory_space<vmem>>, vector<8x1xi32>
    %c32_i32 = arith.constant 32 : i32
    %5 = vector.broadcast %c32_i32 : i32 to vector<8x1xi32>
    %6 = arith.addi %4, %5 : vector<8x1xi32>
    %7 = vector.broadcast %6 : vector<8x1xi32> to vector<8x128xi32>
    %8 = arith.cmpi eq, %0, %7 : vector<8x128xi32>
    %9 = arith.ori %3, %8 : vector<8x128xi1>
    %c0_2 = arith.constant 0 : index
    %c2 = arith.constant 2 : index
    %10 = vector.load %arg1[%c0_2, %c2] : memref<8x4xi32, #tpu.memory_space<vmem>>, vector<8x1xi32>
    %c64_i32 = arith.constant 64 : i32
    %11 = vector.broadcast %c64_i32 : i32 to vector<8x1xi32>
    %12 = arith.addi %10, %11 : vector<8x1xi32>
    %13 = vector.broadcast %12 : vector<8x1xi32> to vector<8x128xi32>
    %14 = arith.cmpi eq, %0, %13 : vector<8x128xi32>
    %15 = arith.ori %9, %14 : vector<8x128xi1>
    %c0_3 = arith.constant 0 : index
    %c3 = arith.constant 3 : index
    %16 = vector.load %arg1[%c0_3, %c3] : memref<8x4xi32, #tpu.memory_space<vmem>>, vector<8x1xi32>
    %c96_i32 = arith.constant 96 : i32
    %17 = vector.broadcast %c96_i32 : i32 to vector<8x1xi32>
    %18 = arith.addi %16, %17 : vector<8x1xi32>
    %19 = vector.broadcast %18 : vector<8x1xi32> to vector<8x128xi32>
    %20 = arith.cmpi eq, %0, %19 : vector<8x128xi32>
    %21 = arith.ori %15, %20 : vector<8x128xi1>
    %22 = arith.extui %21 : vector<8x128xi1> to vector<8x128xi32>
    %23 = arith.sitofp %22 : vector<8x128xi32> to vector<8x128xf32>
    %c0_4 = arith.constant 0 : index
    %c0_5 = arith.constant 0 : index
    %24 = vector.load %arg2[%c0_4, %c0_5] : memref<128x128xf32, #tpu.memory_space<vmem>>, vector<128x128xf32>
    %cst = arith.constant dense<0.000000e+00> : vector<8x128xf32>
    %25 = tpu.matmul %23, %24, %cst {dimension_numbers = #tpu.dot_dimension_numbers<[1], [0], [0], [1], [0, 0, 1, 1], [], []>} : vector<8x128xf32>, vector<128x128xf32>, vector<8x128xf32> -> vector<8x128xf32>
    %c0_6 = arith.constant 0 : index
    %c0_7 = arith.constant 0 : index
    %26 = vector.load %arg3[%c0_6, %c0_7] : memref<8x128xf32, #tpu.memory_space<vmem>>, vector<8x128xf32>
    tpu.vector_store %arg3[%c0_6, %c0_7], %25 {strides = array<i32>} : memref<8x128xf32, #tpu.memory_space<vmem>>, vector<8x128xf32>,
    return
  }
  func.func @transform_0(%arg0: i32) -> (i32, i32) {
    %c0_i32 = arith.constant 0 : i32
    %c0_i32_0 = arith.constant 0 : i32
    return %arg0, %c0_i32 : i32, i32
  }
  func.func @transform_1(%arg0: i32) -> (i32, i32) {
    %c0_i32 = arith.constant 0 : i32
    %c0_i32_0 = arith.constant 0 : i32
    %c0_i32_1 = arith.constant 0 : i32
    return %c0_i32, %c0_i32_0 : i32, i32
  }
  func.func @transform_2(%arg0: i32) -> (i32, i32) {
    %c0_i32 = arith.constant 0 : i32
    %c0_i32_0 = arith.constant 0 : i32
    return %arg0, %c0_i32 : i32, i32
  }
}

</mosaic_0001>

<bundles_post_ra>
// kernel: tpu_custom_call.1
= control target key start
LH: loop header
LB: loop body
LE: loop exit
PB: predicated region body
PF: predicated region fallthrough
CT: control target
= control target key end

     0   :  { %7 = vsyncpa [#allocation3], 0  ;;  %s766_s0 = inlined_call_operand.vmem [shape: s32[16,4], index: 0, kind: input, shape index: {}]   ;;  %s767_s1 = inlined_call_operand.hbm [shape: f32[128,128], index: 1, kind: input, shape index: {}]   ;;  %s768_s2 = inlined_call_operand.hbm [shape: f32[16,128], index: 2, kind: output, shape index: {}]  }
   0x1   :  { %8 = vsyncpa [#allocation4], 0 }
   0x2   :  { %10 = vsyncpa [#allocation4 + $0x1], 0  ;;  %s631_s9 = smov 0   ;;  %s633_s10 = smov 0  }
   0x3   :  { %s635_s11 = smov 0   ;;  %s637_s12 = smov 0  }
   0x4 LB: > { %s652_s13 = sadd.s32 4294967295, %s602_s12   ;;  %s353_s14 = sadd.s32 4294967294, %s602_s12   ;;  %s602_s12 = sphi %s637_s12, %s784_s12   ;;  %s598_s11 = sphi %s635_s11, %s783_s11   ;;  %s594_s10 = sphi %s633_s10, %s782_s10   ;;  %s590_s9 = sphi %s631_s9, %s781_s9  }
   0x5   : > { %s656_s15 = sadd.s32 1, %s602_s12   ;;  %s70_s16 = sadd.s32 1, %s598_s11 }
   0x6   : > { %s67_s17 = ssub.s32 %s602_s12, %s656_s15  ;;  %p80_p0 = scmp.ne.s32.totalorder %s598_s11, %s594_s10 }
   0x7   : > { %p68_p1 = scmp.eq.s32.totalorder %s67_s17, 0  ;;  %p81_p2 = scmp.eq.s32.totalorder %s652_s13, 1 }
   0x8   : > { %p86_p3 = scmp.ne.s32.totalorder %s594_s10, %s590_s9  ;;  %p87_p4 = scmp.eq.s32.totalorder %s353_s14, 1 }
   0x9   : > { %s667_s18 = scalar_select %p68_p1, %s598_s11, %s70_s16  }
   0xa   : > { %p669_p5 = por %p81_p2, %p80_p0  ;;  %p673_p6 = por %p87_p4, %p86_p3 }
   0xb   : > { %p354_p7 = scmp.ge.s32.totalorder %s602_s12, 1  ;;  %p94_p8 = scmp.lt.s32.totalorder %s602_s12, 3 }
   0xc   : > { %s772_s19 = scalar_select %p669_p5, 1, 0 }
   0xd   : > { %s773_s20 = scalar_select %p673_p6, 1, 0 }
   0xe   : > { %p769_p9 = scmp.eq.s32.totalorder %s652_s13, 0  ;;  %p680_p10 = pnand %p354_p7, %p94_p8 }
   0xf   : > { %s604_s22 = smov [#allocation2]   ;;  %s508_s27 = scalar_lea.hbm %s767_s1, 2048 }
  0x10   : > { %s774_s21 = scalar_select %p680_p10, 1, 0 }
  0x11   : > { %s106_s23 = sshll.u32 %s604_s22, 4  ;;  %p449_p11 = pneg %p680_p10  ;;  %s107_s23 = int_to_ptr.vmem [resolvable:$true] %s106_s23 }
  0x12   : > { %p509_p13 = scmp.ne.s32.totalorder %s767_s1, %s508_s27  ;;  %p515_p3 = scmp.lt.u32.totalorder %s508_s27, %s767_s1 }
  0x13   : > { %p688_p12 = pnand %p769_p9, %p449_p11 }
  0x15   : > { %p510_p0 = pneg %p688_p12 }
  0x17   : > { %p511_p1 = pnand %p510_p0, %p509_p13 }
  0x19   : > { %p512_p2 = pneg %p511_p1 }
  0x1b   : > { %p517_p4 = pnand %p515_p3, %p512_p2 }
  0x1d   : > { %520 = shalt.err (!%p517_p4)
}
  0x1e   : > { %s521_s4 = scalar_lea.vmem %s107_s23, 2048  ;;  %p529_p9 = scmp.lt.s32.totalorder %s107_s23, %s107_s23 }
  0x1f   : > { %p522_p7 = scmp.ne.s32.totalorder %s107_s23, %s521_s4  ;;  %p530_p6 = scmp.lt.s32.totalorder %s521_s4, %s521_s4 }
  0x21   : > { %p524_p8 = pnand %p522_p7, %p510_p0  ;;  %p531_p5 = por %p530_p6, %p529_p9 }
  0x23   : > { %p525_p11 = pneg %p524_p8 }
  0x25   : > { %p532_p10 = pnand %p531_p5, %p525_p11 }
  0x27   : > { %535 = shalt.err (!%p532_p10)
}
  0x28   : > { %s605_s5 = smov 128   ;;  %s606_s6 = smov 8  }
  0x29   : > { %452 = dma.hbm_to_vmem [thread:$0]  (!%p688_p12), %s767_s1, 2048, %s107_s23, [#allocation3], %s605_s5, %s605_s5, %s606_s6  }
  0x2a   : > { %p776_p13 = scmp.ne.s32.totalorder %s774_s21, 0 }
  0x2b   : > { %p777_p1 = scmp.eq.s32.totalorder (!%p776_p13), %s652_s13, 0 }
  0x2c   : > { %129 = sbr.rel (%p776_p13) target bundleno = 422 (0x1a6), region = 28 }
  0x33   : > { %581 = dma.done.wait (%p777_p1), [#allocation3], 2048   ;;  %p778_p0 = pmov %p777_p1 }
  0x34   : > { %p150_p5 = scmp.lt.s32.totalorder %s652_s13, 1  ;;  %v607_v0 = vmov 0   ;;  %v608_v1 = vmov 2   ;;  %v609_v2 = vmov 0.0|0.0   ;;  %v181_v4 = vld [vmem:[#allocation2] sm:$0xff]  ;;  %v182_v5 = vld [vmem:[#allocation2 + $0x8] sm:$0xff]  ;;  %v154_v34 = vlaneseq }
  0x35   : > { %583 = vsyncadd (%p778_p0), [#allocation3], 4294965248  ;;  %503 = vset.pattern.permute.xlu0 %v607_v0  ;;  %505 = vset.pattern.permute.xlu1 %v608_v1  ;;  %v420_v7 = vpack.c.bf16 %v182_v5, %v181_v4  ;;  %v183_v8 = vld [vmem:[#allocation2 + $0x10] sm:$0xff]  ;;  %v184_v9 = vld [vmem:[#allocation2 + $0x18] sm:$0xff]  ;;  %v610_v15 = vmov 1   ;;  %v611_v16 = vmov 3  }
  0x36   : > { %s151_s14 = scalar_select %p150_p5, %s652_s13, 1  ;;  %419 = vmatprep.subr.bf16.mxu0 %v609_v2  ;;  %v423_v11 = vpack.c.bf16 %v184_v9, %v183_v8  ;;  %v185_v13 = vld [vmem:[#allocation2 + $0x20] sm:$0xff]  ;;  %v186_v14 = vld [vmem:[#allocation2 + $0x28] sm:$0xff]  ;;  %v187_v18 = vld [vmem:[#allocation2 + $0x30] sm:$0xff]  ;;  %vm612_vm0 = vmmov 0   ;;  %v613_v20 = vmov 0.0  }
  0x37   : > { %421 = vmatpush3.bf16.msra.mxu0 %v420_v7  ;;  %v426_v17 = vpack.c.bf16 %v186_v14, %v185_v13  ;;  %v188_v19 = vld [vmem:[#allocation2 + $0x38] sm:$0xff]  ;;  %416 = vmatprep.mubr.msk.f32.mxu0 %vm612_vm0, %v613_v20  ;;  %v189_v22 = vld [vmem:[#allocation2 + $0x40] sm:$0xff]  ;;  %v190_v23 = vld [vmem:[#allocation2 + $0x48] sm:$0xff]  ;;  %v155_v36 = vand.u32 127, %v154_v34  ;;  %v614_v40 = vmov 1.0   ;;  %s147_s23 = sand.u32 1, %s594_s10  }
  0x38   : > { %s360_s16 = sshll.u32 %s151_s14, 3  ;;  %422 = vmatprep.subr.bf16.mxu0 %v609_v2  ;;  %v429_v21 = vpack.c.bf16 %v188_v19, %v187_v18  ;;  %v432_v24 = vpack.c.bf16 %v190_v23, %v189_v22  ;;  %v191_v25 = vld [vmem:[#allocation2 + $0x50] sm:$0xff]  ;;  %v192_v26 = vld [vmem:[#allocation2 + $0x58] sm:$0xff]  ;;  %v193_v28 = vld [vmem:[#allocation2 + $0x60] sm:$0xff]  ;;  %s359_s24 = sshll.u32 %s147_s23, 3 }
  0x39   : > { %s153_s22 = scalar_lea.vmem %s766_s0, %s360_s16  ;;  %v435_v27 = vpack.c.bf16 %v192_v26, %v191_v25  ;;  %v194_v29 = vld [vmem:[#allocation2 + $0x68] sm:$0xff]  ;;  %v195_v31 = vld [vmem:[#allocation2 + $0x70] sm:$0xff]  ;;  %v196_v32 = vld [vmem:[#allocation2 + $0x78] sm:$0xff]  ;;  %s149_s25 = scalar_lea.vmem [#allocation5], %s359_s24 }
  0x3a   : > { %v156_v3 = vld [vmem:[%s153_s22] sm:$0xff]  ;;  %v438_v30 = vpack.c.bf16 %v194_v29, %v193_v28  ;;  %v441_v33 = vpack.c.bf16 %v196_v32, %v195_v31  ;;  %s282_s26 = sshll.u32 %s149_s25, 4  ;;  %s364_s27 = sshll.u32 %s652_s13, 7  ;;  %s721_s26 = int_to_ptr.vmem [resolvable:$true] %s282_s26 }
  0x3b   : > { %158 = vperm.xlu0 %503, %v156_v3   ;;  %v167_v6 = vadd.s32 64, %v156_v3  ;;  %v161_v10 = vadd.s32 32, %v156_v3  ;;  %v173_v12 = vadd.s32 96, %v156_v3  ;;  %424 = vmatpush3.bf16.msra.mxu0 %v423_v11  ;;  %s726_s30 = scalar_lea.hbm %s768_s2, %s364_s27  ;;  %s269_s3 = scalar_lea.sflag [#allocation4], %s147_s23 }
  0x3c   : > { %425 = vmatprep.subr.bf16.mxu0 %v609_v2  ;;  %s536_s4 = scalar_lea.vmem %s721_s26, 128  ;;  %p779_p9 = scmp.ne.s32.totalorder %s772_s19, 0 }
  0x3d   : > { %169 = vperm.xlu1 %505, %v167_v6   ;;  %p537_p6 = scmp.ne.s32.totalorder %s721_s26, %s536_s4  ;;  %s615_s13 = smov [#allocation5]  }
  0x3e   : > { %s540_s5 = sshll.u32 %s615_s13, 4  ;;  %s541_s5 = int_to_ptr.vmem [resolvable:$false] %s540_s5 }
  0x3f   : > { %504 = vset.pattern.permute.xlu0 %v610_v15  ;;  %427 = vmatpush3.bf16.msra.mxu0 %v426_v17  ;;  %p538_p10 = pnand %p537_p6, %p779_p9  ;;  %s542_s6 = scalar_lea.vmem %s541_s5, 256 }
  0x40   : > { %163 = vperm.xlu0 %504, %v161_v10   ;;  %428 = vmatprep.subr.bf16.mxu0 %v609_v2  ;;  %p543_p2 = scmp.lt.s32.totalorder %s721_s26, %s541_s5  ;;  %p544_p3 = scmp.lt.s32.totalorder %s542_s6, %s536_s4 }
  0x41   : > { %506 = vset.pattern.permute.xlu1 %v611_v16  ;;  %p539_p12 = pneg %p538_p10 }
  0x42   : > { %175 = vperm.xlu1 %506, %v173_v12   ;;  %p545_p4 = por %p544_p3, %p543_p2 }
  0x43   : > { %430 = vmatpush3.bf16.msra.mxu0 %v429_v21 }
  0x44   : > { %507 = vset.pattern.permute.xlu0 %v611_v16  ;;  %431 = vmatprep.subr.bf16.mxu0 %v609_v2  ;;  %p546_p7 = pnand %p545_p4, %p539_p12 }
  0x47   : > { %433 = vmatpush3.bf16.msra.mxu0 %v432_v24 }
  0x48   : > { %434 = vmatprep.subr.bf16.mxu0 %v609_v2 }
  0x4b   : > { %436 = vmatpush3.bf16.msra.mxu0 %v435_v27 }
  0x4c   : > { %437 = vmatprep.subr.bf16.mxu0 %v609_v2 }
  0x4f   : > { %439 = vmatpush3.bf16.msra.mxu0 %v438_v30 }
  0x50   : > { %440 = vmatprep.subr.bf16.mxu0 %v609_v2 }
  0x53   : > { %442 = vmatpush3.bf16.msra.mxu0 %v441_v33 }
  0xba   : > { %v159_v35 = vpop.permute.xlu0 %158 }
  0xbb   : > { %vm160_vm1 = vcmp.eq.s32.totalorder %v155_v36, %v159_v35 }
  0xbc   : > { %v170_v37 = vpop.permute.xlu1 %169 }
  0xbd   : > { %vm171_vm3 = vcmp.eq.s32.totalorder %v155_v36, %v170_v37 }
  0xbf   : > { %v164_v38 = vpop.permute.xlu0 %163 }
  0xc0   : > { %vm165_vm2 = vcmp.eq.s32.totalorder %v155_v36, %v164_v38 }
  0xc1   : > { %vm166_vm4 = vmor %vm160_vm1, %vm165_vm2  ;;  %v176_v39 = vpop.permute.xlu1 %175 }
  0xc2   : > { %vm172_vm5 = vmor %vm166_vm4, %vm171_vm3  ;;  %vm177_vm6 = vcmp.eq.s32.totalorder %v155_v36, %v176_v39 }
  0xc3   : > { %vm178_vm7 = vmor %vm172_vm5, %vm177_vm6 }
  0xc4   : > { %417 = vmatmul.mubr.msk.f32.vlgmr.msra.gmra.mrb[0].mxu0 %vm178_vm7, %v614_v40 }
 0x197   : > { %v263_v41 = vpop.f32.mrb[0].mxu0 }
 0x198   : > { %267 = vst [vmem:[%s149_s25] sm:$0xff] %v263_v41  ;;  %v418_v42 = vpop.f32.mrb[1].mxu0 }
 0x199   : > { %549 = shalt.err (!%p546_p7)
}
 0x19a   : > { %s550_s7 = scalar_lea.hbm %s726_s30, 128  ;;  %s554_s16 = scalar_lea.hbm %s768_s2, 256 }
 0x19b   : > { %p551_p8 = scmp.ne.s32.totalorder %s726_s30, %s550_s7  ;;  %p555_p1 = scmp.lt.u32.totalorder %s726_s30, %s768_s2 }
 0x19c   : > { %p556_p0 = scmp.lt.u32.totalorder %s554_s16, %s550_s7  ;;  %p558_p6 = scmp.lt.u32.totalorder %s550_s7, %s726_s30 }
 0x19d   : > { %p552_p11 = pnand %p551_p8, %p779_p9 }
 0x19e   : > { %p557_p5 = por %p556_p0, %p555_p1 }
 0x19f   : > { %p553_p13 = pneg %p552_p11 }
 0x1a0   : > { %p559_p10 = por %p558_p6, %p557_p5 }
 0x1a2   : > { %p560_p12 = pnand %p559_p10, %p553_p13 }
 0x1a4   : > { %563 = shalt.err (!%p560_p12)
}
 0x1a5   : > { %447 = dma.vmem_to_hbm [thread:$0]  (%p779_p9), %s721_s26, 128, %s726_s30, %s269_s3  }
 0x1a6 PF: > { %p459_p2 = scmp.ge.s32.totalorder %s602_s12, 2  ;;  %s294_s22 = sand.u32 1, %s590_s9  }
 0x1a7   : > { %p780_p3 = scmp.ne.s32.totalorder %s773_s20, 0  ;;  %s295_s23 = scalar_lea.sflag [#allocation4], %s294_s22 }
 0x1a9   : > { %p454_p4 = pnand %p459_p2, %p780_p3 }
 0x1ab   : > { %585 = dma.done.wait (!%p454_p4), %s295_s23, 128  }
 0x1ac   : > { %587 = vsyncadd (!%p454_p4), %s295_s23, 4294967168  ;;  %p13_p7 = scmp.ge.s32.totalorder %s656_s15, 4   ;;  %s781_s9 = smov %s594_s10 }
 0x1ad   : > { %s782_s10 = smov %s598_s11  ;;  %s783_s11 = smov %s667_s18 }
 0x1ae   : > { %s784_s12 = smov %s656_s15  ;;  %15 = sbr.rel (!%p13_p7) target bundleno = 4 (0x4), region = 68 }
 0x1b5   :  { %300 = vsyncpa [#allocation3], 1 }
 0x1b6   :  { %302 = vsyncpa [#allocation3 + $0x1], 1 }
 0x1b7   :  { %303 = vsyncpa [#allocation4], 1 }
 0x1b8   :  { %305 = vsyncpa [#allocation4 + $0x1], 1 }

</bundles_post_ra>
